<compile_context>
chip_gen: v6e
topology: v6e:2x2x1
jax: 0.10.0
libtpu: 0.0.40
codegen_flags: <defaults>
</compile_context>

<pallas_src>
import functools

import jax
import jax.numpy as jnp
from jax.experimental import pallas as pl
from jax.experimental.pallas import tpu as pltpu

EPS = 1e-5
MOMENTUM = 0.9

_VMEM_LIMIT = 48 << 20          # scoped-VMEM request: safe on v5e/v6e/v7x
_WORKING_BUDGET = 40 << 20      # target resident working set per pass
_FUSED_MAX_F32_BYTES = 4 << 20  # use the fused path when x (as f32) is this small


# ----------------------------------------------------------------------------
# Kernels
# ----------------------------------------------------------------------------
def _bn_fused_kernel(x_ref, g_ref, b_ref, mm_ref, mv_ref,
                     y_ref, nmm_ref, nmv_ref, *, inv_count):
    """Whole activation resident in VMEM: stats + normalization in one kernel."""
    x = x_ref[...].astype(jnp.float32)                        # (N, C, HW)
    s = jnp.sum(x, axis=2, keepdims=True)                     # (N, C, 1)
    mean = jnp.sum(s, axis=0, keepdims=True) * inv_count      # (1, C, 1)
    xc = x - mean
    v = jnp.sum(xc * xc, axis=2, keepdims=True)               # centered var
    var = jnp.sum(v, axis=0, keepdims=True) * inv_count       # (1, C, 1)
    scale = g_ref[...] * jax.lax.rsqrt(var + EPS)              # EUP rsqrt
    y_ref[...] = (xc * scale + b_ref[...]).astype(y_ref.dtype)
    nmm_ref[...] = MOMENTUM * mm_ref[...] + (1.0 - MOMENTUM) * mean
    nmv_ref[...] = MOMENTUM * mv_ref[...] + (1.0 - MOMENTUM) * var


def _bn_partial_stats_kernel(x_ref, psum_ref, psq_ref, acc_s, acc_q):
    """Streamed pass 1: per-row partial sum / sum-of-squares for one group.

    Grid = (row_block, group, hw_tile); the hw_tile axis is the reduction.
    Per-tile accumulation is elementwise (VPU only); the cross-lane (XLU)
    reduction runs exactly once per (row_block, group) in the finalize step.
    """
    j = pl.program_id(2)

    @pl.when(j == 0)
    def _init():
        acc_s[...] = jnp.zeros_like(acc_s)
        acc_q[...] = jnp.zeros_like(acc_q)

    x = x_ref[...].astype(jnp.float32)          # (tile_r, tile_hw)
    acc_s[...] += x                              # pure VPU adds, hide under DMA
    acc_q[...] += x * x

    @pl.when(j == pl.num_programs(2) - 1)
    def _finalize():
        psum_ref[...] = jnp.sum(acc_s[...], axis=1, keepdims=True)[None]
        psq_ref[...] = jnp.sum(acc_q[...], axis=1, keepdims=True)[None]


def _bn_apply_kernel(x_ref, scale_ref, bias_ref, y_ref):
    """Streamed pass 2: y = x * scale + bias (per-row, broadcast along lanes)."""
    y = x_ref[...].astype(jnp.float32) * scale_ref[...] + bias_ref[...]
    y_ref[...] = y.astype(y_ref.dtype)


# ----------------------------------------------------------------------------
# Tiling helpers
# ----------------------------------------------------------------------------
def _choose_tiles(R, HW, itemsize):
    """Pick (tile_r, tile_hw).

    tile_hw: a multiple of 128 dividing HW (or the full HW when HW % 128 != 0,
             in which case row tiling bounds the block size instead).
    tile_r:  a multiple of 8 dividing R (or the full R).
    Prefers the widest lane tile that fits the per-buffer budget.
    """
    # pass 1 holds 2 x-buffers + 2 f32 accumulators of tile extent;
    # pass 2 holds 2 x-buffers + 2 y-buffers.
    n_bufs = max(4.0, 2.0 + 2.0 * 4.0 / itemsize)
    budget = int(_WORKING_BUDGET / n_bufs)
    if HW % 128 == 0:
        hw_divs = [t for t in range(128, HW + 1, 128) if HW % t == 0]
    else:
        hw_divs = [HW]
    if R % 8 == 0:
        r_divs = [r for r in range(8, R + 1, 8) if R % r == 0]
    else:
        r_divs = [R]
    for t_hw in sorted(hw_divs, reverse=True):
        for t_r in sorted(r_divs, reverse=True):
            if t_r * t_hw * itemsize <= budget:
                return t_r, t_hw
    return min(r_divs), min(hw_divs)     # nothing fits: smallest legal block


def _stats_pass(x2, tile_r, tile_hw):
    """Streamed per-row partial sums/sumsqs.  Returns (psum, psq): (G, R, 1)."""
    R, HW = x2.shape
    n_rb = R // tile_r
    n_t = HW // tile_hw
    # Split the HW tiles into 2 independent "parallel" groups so the stats
    # pass can use both v7x TensorCores (no-op on single-TC v5e/v6e).
    G = 2 if (n_t >= 2 and n_t % 2 == 0) else 1
    n_j = n_t // G
    return pl.pallas_call(
        _bn_partial_stats_kernel,
        out_shape=(jax.ShapeDtypeStruct((G, R, 1), jnp.float32),
                   jax.ShapeDtypeStruct((G, R, 1), jnp.float32)),
        grid=(n_rb, G, n_j),
        in_specs=[pl.BlockSpec((tile_r, tile_hw),
                               lambda rb, g, j, n_j=n_j: (rb, g * n_j + j))],
        out_specs=(pl.BlockSpec((1, tile_r, 1), lambda rb, g, j: (g, rb, 0)),
                   pl.BlockSpec((1, tile_r, 1), lambda rb, g, j: (g, rb, 0))),
        scratch_shapes=[pltpu.VMEM((tile_r, tile_hw), jnp.float32),
                        pltpu.VMEM((tile_r, tile_hw), jnp.float32)],
        compiler_params=pltpu.CompilerParams(
            dimension_semantics=("parallel", "parallel", "arbitrary"),
            vmem_limit_bytes=_VMEM_LIMIT),
    )(x2)


def _apply_pass(x2, scale_rows, bias_rows, tile_r, tile_hw, out_dtype):
    """Streamed y = x * scale_row + bias_row over the (R, HW) slab."""
    R, HW = x2.shape
    return pl.pallas_call(
        _bn_apply_kernel,
        out_shape=jax.ShapeDtypeStruct((R, HW), out_dtype),
        grid=(R // tile_r, HW // tile_hw),
        in_specs=[
            pl.BlockSpec((tile_r, tile_hw), lambda rb, j: (rb, j)),
            pl.BlockSpec((tile_r, 1), lambda rb, j: (rb, 0)),
            pl.BlockSpec((tile_r, 1), lambda rb, j: (rb, 0)),
        ],
        out_specs=pl.BlockSpec((tile_r, tile_hw), lambda rb, j: (rb, j)),
        compiler_params=pltpu.CompilerParams(
            dimension_semantics=("parallel", "parallel"),
            vmem_limit_bytes=_VMEM_LIMIT),
    )(x2, scale_rows, bias_rows)


# ----------------------------------------------------------------------------
# Wrapper
# ----------------------------------------------------------------------------
def batch_norm_forward(x, gamma, beta, moving_mean, moving_var, *,
                       is_training=True, tile_hw=None, tile_r=None,
                       force_streamed=False):
    """BatchNorm forward.

    x: (N, C, H, W) or (N, C); gamma/beta/moving_*: (1, C, 1, 1) or (1, C).
    Returns (Y, new_moving_mean, new_moving_var) with the moving stats in the
    same shape as the inputs (unchanged when is_training=False).
    """
    orig_ndim = x.ndim
    x4 = x.reshape(x.shape[0], x.shape[1], 1, 1) if orig_ndim == 2 else x
    N, C, H, W = x4.shape
    HW = H * W
    R = N * C
    stat_shape = moving_mean.shape
    itemsize = jnp.dtype(x4.dtype).itemsize

    g_c = gamma.reshape(C).astype(jnp.float32)
    b_c = beta.reshape(C).astype(jnp.float32)
    mm_c = moving_mean.reshape(C).astype(jnp.float32)
    mv_c = moving_var.reshape(C).astype(jnp.float32)

    def _finish(y2_or_y3):
        y = y2_or_y3.reshape(N, C, H, W)
        return y.reshape(N, C) if orig_ndim == 2 else y

    # ---- inference: normalize with the (fixed) moving statistics -----------
    if not is_training:
        scale_c = g_c * jax.lax.rsqrt(mv_c + EPS)
        bias_c = b_c - mm_c * scale_c
        x2 = x4.reshape(R, HW)                       # free view of NCHW
        a_r, a_hw = _choose_tiles(R, HW, itemsize)
        t_r, t_hw = (tile_r or a_r), (tile_hw or a_hw)
        assert R % t_r == 0 and HW % t_hw == 0, (R, t_r, HW, t_hw)
        scale_rows = jnp.tile(scale_c, N).reshape(R, 1)   # row r -> channel r % C
        bias_rows = jnp.tile(bias_c, N).reshape(R, 1)
        y2 = _apply_pass(x2, scale_rows, bias_rows, t_r, t_hw, x4.dtype)
        return _finish(y2), moving_mean, moving_var

    inv_count = 1.0 / float(N * HW)

    # ---- fused path: whole activation resident in VMEM ---------------------
    if (not force_streamed) and (R * HW * 4 <= _FUSED_MAX_F32_BYTES):
        x3 = x4.reshape(N, C, HW)
        p3 = lambda a: a.reshape(1, C, 1)
        y3, nmm, nmv = pl.pallas_call(
            functools.partial(_bn_fused_kernel, inv_count=inv_count),
            out_shape=(jax.ShapeDtypeStruct((N, C, HW), x4.dtype),
                       jax.ShapeDtypeStruct((1, C, 1), jnp.float32),
                       jax.ShapeDtypeStruct((1, C, 1), jnp.float32)),
            grid=(1,),
            in_specs=[pl.BlockSpec((N, C, HW), lambda i: (0, 0, 0)),
                      pl.BlockSpec((1, C, 1), lambda i: (0, 0, 0)),
                      pl.BlockSpec((1, C, 1), lambda i: (0, 0, 0)),
                      pl.BlockSpec((1, C, 1), lambda i: (0, 0, 0)),
                      pl.BlockSpec((1, C, 1), lambda i: (0, 0, 0))],
            out_specs=(pl.BlockSpec((N, C, HW), lambda i: (0, 0, 0)),
                       pl.BlockSpec((1, C, 1), lambda i: (0, 0, 0)),
                       pl.BlockSpec((1, C, 1), lambda i: (0, 0, 0))),
            compiler_params=pltpu.CompilerParams(
                dimension_semantics=("arbitrary",),
                vmem_limit_bytes=_VMEM_LIMIT),
        )(x3, p3(g_c), p3(b_c), p3(mm_c), p3(mv_c))
        return _finish(y3), nmm.reshape(stat_shape), nmv.reshape(stat_shape)

    # ---- streamed path: two pipelined passes over HBM ----------------------
    x2 = x4.reshape(R, HW)                           # free view of NCHW
    a_r, a_hw = _choose_tiles(R, HW, itemsize)
    t_r, t_hw = (tile_r or a_r), (tile_hw or a_hw)
    assert R % t_r == 0 and HW % t_hw == 0, (R, t_r, HW, t_hw)

    psum, psq = _stats_pass(x2, t_r, t_hw)           # (G, R, 1) each, f32

    # Tiny per-channel finalize in plain JAX (also combines v7x per-core parts).
    sum_c = psum.sum(axis=0)[:, 0].reshape(N, C).sum(axis=0)   # (C,)
    sq_c = psq.sum(axis=0)[:, 0].reshape(N, C).sum(axis=0)
    mean = sum_c * inv_count
    # E[x^2] - E[x]^2 can go slightly negative in f32: clamp before rsqrt.
    var = jnp.maximum(sq_c * inv_count - mean * mean, 0.0)
    scale_c = g_c * jax.lax.rsqrt(var + EPS)
    bias_c = b_c - mean * scale_c
    new_mm = MOMENTUM * mm_c + (1.0 - MOMENTUM) * mean
    new_mv = MOMENTUM * mv_c + (1.0 - MOMENTUM) * var

    scale_rows = jnp.tile(scale_c, N).reshape(R, 1)   # row r -> channel r % C
    bias_rows = jnp.tile(bias_c, N).reshape(R, 1)
    y2 = _apply_pass(x2, scale_rows, bias_rows, t_r, t_hw, x4.dtype)

    return _finish(y2), new_mm.reshape(stat_shape), new_mv.reshape(stat_shape)


# ----------------------------------------------------------------------------
# Demo / self-check
# ----------------------------------------------------------------------------
if __name__ == "__main__":
    key = jax.random.PRNGKey(0)
    k1, k2 = jax.random.split(key)

    def reference(x, gamma, beta, mm, mv):
        mean = jnp.mean(x, axis=(0, 2, 3), keepdims=True)
        var = jnp.mean((x - mean) ** 2, axis=(0, 2, 3), keepdims=True)
        y = gamma * (x - mean) / jnp.sqrt(var + EPS) + beta
        return (y, MOMENTUM * mm + (1.0 - MOMENTUM) * mean,
                MOMENTUM * mv + (1.0 - MOMENTUM) * var)

    fwd = jax.jit(batch_norm_forward,
                  static_argnames=("is_training", "tile_hw", "tile_r",
                                   "force_streamed"))

    # Deterministic parameter init per BatchNorm.__init__ (num_dims=4).
    N, C, H, W = 2, 4, 16, 16
    gamma = jnp.ones((1, C, 1, 1), jnp.float32)
    beta = jnp.zeros((1, C, 1, 1), jnp.float32)
    mm0 = jnp.zeros((1, C, 1, 1), jnp.float32)
    mv0 = jnp.zeros((1, C, 1, 1), jnp.float32)

    ok = True

    # 1) Demo-sized activation -> fused single-call path.
    x = jax.random.normal(k1, (N, C, H, W), jnp.float32)
    y, nmm, nmv = fwd(x, gamma, beta, mm0, mv0)
    jax.block_until_ready((y, nmm, nmv))
    y_r, mm_r, mv_r = reference(x, gamma, beta, mm0, mv0)
    ok &= bool(jnp.allclose(y, y_r, atol=1e-4, rtol=1e-4))
    ok &= bool(jnp.allclose(nmm, mm_r, atol=1e-5, rtol=1e-4))
    ok &= bool(jnp.allclose(nmv, mv_r, atol=1e-5, rtol=1e-4))

    # 2) Streamed 2-pass path (forced, small tiles) so the VPU-accumulate /
    #    finalize / parallel-group machinery runs on hardware:
    #    HW = 1024, tile_hw = 128 -> 8 HW tiles = 2 parallel groups x 4 steps.
    xs = jax.random.normal(k2, (N, C, 32, 32), jnp.float32)
    ys, smm, smv = fwd(xs, gamma, beta, mm0, mv0,
                       force_streamed=True, tile_hw=128)
    jax.block_until_ready((ys, smm, smv))
    ys_r, smm_r, smv_r = reference(xs, gamma, beta, mm0, mv0)
    ok &= bool(jnp.allclose(ys, ys_r, atol=1e-4, rtol=1e-4))
    ok &= bool(jnp.allclose(smm, smm_r, atol=1e-5, rtol=1e-4))
    ok &= bool(jnp.allclose(smv, smv_r, atol=1e-5, rtol=1e-4))

    # 3) Inference mode (apply-only path), using the batch stats as moving stats.
    y_ev, _, _ = batch_norm_forward(x, gamma, beta, mm_r, mv_r,
                                    is_training=False)
    jax.block_until_ready(y_ev)
    y_ev_r = gamma * (x - mm_r) / jnp.sqrt(mv_r + EPS) + beta
    ok &= bool(jnp.allclose(y_ev, y_ev_r, atol=1e-4, rtol=1e-4))

    if not ok:
        raise SystemExit("BatchNorm Pallas kernel mismatch vs reference")
    print("KERNEL_OK")
</pallas_src>

<mosaic_0001>
module attributes {stable_mosaic.version = 11 : i64} {
  func.func @_bn_fused_kernel(%arg0: i32, %arg1: memref<2x4x256xf32, #tpu.memory_space<vmem>>, %arg2: memref<1x4x1xf32, #tpu.memory_space<vmem>>, %arg3: memref<1x4x1xf32, #tpu.memory_space<vmem>>, %arg4: memref<1x4x1xf32, #tpu.memory_space<vmem>>, %arg5: memref<1x4x1xf32, #tpu.memory_space<vmem>>, %arg6: memref<2x4x256xf32, #tpu.memory_space<vmem>>, %arg7: memref<1x4x1xf32, #tpu.memory_space<vmem>>, %arg8: memref<1x4x1xf32, #tpu.memory_space<vmem>>) attributes {dimension_semantics = [#tpu.dimension_semantics<arbitrary>], iteration_bounds = array<i64: 1>, scalar_prefetch = 0 : i64, scratch_operands = 0 : i64, tpu.core_type = #tpu.core_type<tc>, window_params = [{pipeline_mode = #tpu.pipeline_mode<synchronous>, transform_indices = @transform_0, window_bounds = array<i64: 2, 4, 256>}, {pipeline_mode = #tpu.pipeline_mode<synchronous>, transform_indices = @transform_1, window_bounds = array<i64: 1, 4, 1>}, {pipeline_mode = #tpu.pipeline_mode<synchronous>, transform_indices = @transform_2, window_bounds = array<i64: 1, 4, 1>}, {pipeline_mode = #tpu.pipeline_mode<synchronous>, transform_indices = @transform_3, window_bounds = array<i64: 1, 4, 1>}, {pipeline_mode = #tpu.pipeline_mode<synchronous>, transform_indices = @transform_4, window_bounds = array<i64: 1, 4, 1>}, {pipeline_mode = #tpu.pipeline_mode<synchronous>, transform_indices = @transform_5, window_bounds = array<i64: 2, 4, 256>}, {pipeline_mode = #tpu.pipeline_mode<synchronous>, transform_indices = @transform_6, window_bounds = array<i64: 1, 4, 1>}, {pipeline_mode = #tpu.pipeline_mode<synchronous>, transform_indices = @transform_7, window_bounds = array<i64: 1, 4, 1>}]} {
    %c0 = arith.constant 0 : index
    %c0_0 = arith.constant 0 : index
    %c0_1 = arith.constant 0 : index
    %0 = vector.load %arg1[%c0, %c0_0, %c0_1] : memref<2x4x256xf32, #tpu.memory_space<vmem>>, vector<2x4x256xf32>
    %cst = arith.constant dense<0.000000e+00> : vector<2x4xf32>
    %1 = vector.multi_reduction <add>, %0, %cst [2] : vector<2x4x256xf32> to vector<2x4xf32>
    %2 = vector.shape_cast %1 : vector<2x4xf32> to vector<2x4x1xf32>
    %cst_2 = arith.constant dense<0.000000e+00> : vector<4x1xf32>
    %3 = vector.multi_reduction <add>, %2, %cst_2 [0] : vector<2x4x1xf32> to vector<4x1xf32>
    %4 = vector.shape_cast %3 : vector<4x1xf32> to vector<1x4x1xf32>
    %cst_3 = arith.constant 0.001953125 : f32
    %5 = vector.broadcast %cst_3 : f32 to vector<1x4x1xf32>
    %6 = arith.mulf %4, %5 : vector<1x4x1xf32>
    %7 = vector.broadcast %6 : vector<1x4x1xf32> to vector<2x4x256xf32>
    %8 = arith.subf %0, %7 : vector<2x4x256xf32>
    %9 = arith.mulf %8, %8 : vector<2x4x256xf32>
    %cst_4 = arith.constant dense<0.000000e+00> : vector<2x4xf32>
    %10 = vector.multi_reduction <add>, %9, %cst_4 [2] : vector<2x4x256xf32> to vector<2x4xf32>
    %11 = vector.shape_cast %10 : vector<2x4xf32> to vector<2x4x1xf32>
    %cst_5 = arith.constant dense<0.000000e+00> : vector<4x1xf32>
    %12 = vector.multi_reduction <add>, %11, %cst_5 [0] : vector<2x4x1xf32> to vector<4x1xf32>
    %13 = vector.shape_cast %12 : vector<4x1xf32> to vector<1x4x1xf32>
    %cst_6 = arith.constant 0.001953125 : f32
    %14 = vector.broadcast %cst_6 : f32 to vector<1x4x1xf32>
    %15 = arith.mulf %13, %14 : vector<1x4x1xf32>
    %c0_7 = arith.constant 0 : index
    %c0_8 = arith.constant 0 : index
    %c0_9 = arith.constant 0 : index
    %16 = vector.load %arg2[%c0_7, %c0_8, %c0_9] : memref<1x4x1xf32, #tpu.memory_space<vmem>>, vector<1x4x1xf32>
    %cst_10 = arith.constant 9.99999974E-6 : f32
    %17 = vector.broadcast %cst_10 : f32 to vector<1x4x1xf32>
    %18 = arith.addf %15, %17 : vector<1x4x1xf32>
    %19 = math.rsqrt %18 : vector<1x4x1xf32>
    %20 = arith.mulf %16, %19 : vector<1x4x1xf32>
    %21 = vector.broadcast %20 : vector<1x4x1xf32> to vector<2x4x256xf32>
    %22 = arith.mulf %8, %21 : vector<2x4x256xf32>
    %c0_11 = arith.constant 0 : index
    %c0_12 = arith.constant 0 : index
    %c0_13 = arith.constant 0 : index
    %23 = vector.load %arg3[%c0_11, %c0_12, %c0_13] : memref<1x4x1xf32, #tpu.memory_space<vmem>>, vector<1x4x1xf32>
    %24 = vector.broadcast %23 : vector<1x4x1xf32> to vector<2x4x256xf32>
    %25 = arith.addf %22, %24 : vector<2x4x256xf32>
    %c0_14 = arith.constant 0 : index
    %c0_15 = arith.constant 0 : index
    %c0_16 = arith.constant 0 : index
    %26 = vector.load %arg6[%c0_14, %c0_15, %c0_16] : memref<2x4x256xf32, #tpu.memory_space<vmem>>, vector<2x4x256xf32>
    tpu.vector_store %arg6[%c0_14, %c0_15, %c0_16], %25 {strides = array<i32>} : memref<2x4x256xf32, #tpu.memory_space<vmem>>, vector<2x4x256xf32>,
    %c0_17 = arith.constant 0 : index
    %c0_18 = arith.constant 0 : index
    %c0_19 = arith.constant 0 : index
    %27 = vector.load %arg4[%c0_17, %c0_18, %c0_19] : memref<1x4x1xf32, #tpu.memory_space<vmem>>, vector<1x4x1xf32>
    %cst_20 = arith.constant 0.899999976 : f32
    %28 = vector.broadcast %cst_20 : f32 to vector<1x4x1xf32>
    %29 = arith.mulf %28, %27 : vector<1x4x1xf32>
    %cst_21 = arith.constant 1.000000e-01 : f32
    %30 = vector.broadcast %cst_21 : f32 to vector<1x4x1xf32>
    %31 = arith.mulf %30, %6 : vector<1x4x1xf32>
    %32 = arith.addf %29, %31 : vector<1x4x1xf32>
    %c0_22 = arith.constant 0 : index
    %c0_23 = arith.constant 0 : index
    %c0_24 = arith.constant 0 : index
    %33 = vector.load %arg7[%c0_22, %c0_23, %c0_24] : memref<1x4x1xf32, #tpu.memory_space<vmem>>, vector<1x4x1xf32>
    tpu.vector_store %arg7[%c0_22, %c0_23, %c0_24], %32 {strides = array<i32>} : memref<1x4x1xf32, #tpu.memory_space<vmem>>, vector<1x4x1xf32>,
    %c0_25 = arith.constant 0 : index
    %c0_26 = arith.constant 0 : index
    %c0_27 = arith.constant 0 : index
    %34 = vector.load %arg5[%c0_25, %c0_26, %c0_27] : memref<1x4x1xf32, #tpu.memory_space<vmem>>, vector<1x4x1xf32>
    %cst_28 = arith.constant 0.899999976 : f32
    %35 = vector.broadcast %cst_28 : f32 to vector<1x4x1xf32>
    %36 = arith.mulf %35, %34 : vector<1x4x1xf32>
    %cst_29 = arith.constant 1.000000e-01 : f32
    %37 = vector.broadcast %cst_29 : f32 to vector<1x4x1xf32>
    %38 = arith.mulf %37, %15 : vector<1x4x1xf32>
    %39 = arith.addf %36, %38 : vector<1x4x1xf32>
    %c0_30 = arith.constant 0 : index
    %c0_31 = arith.constant 0 : index
    %c0_32 = arith.constant 0 : index
    %40 = vector.load %arg8[%c0_30, %c0_31, %c0_32] : memref<1x4x1xf32, #tpu.memory_space<vmem>>, vector<1x4x1xf32>
    tpu.vector_store %arg8[%c0_30, %c0_31, %c0_32], %39 {strides = array<i32>} : memref<1x4x1xf32, #tpu.memory_space<vmem>>, vector<1x4x1xf32>,
    return
  }
  func.func @transform_0(%arg0: i32) -> (i32, i32, i32) {
    %c0_i32 = arith.constant 0 : i32
    %c0_i32_0 = arith.constant 0 : i32
    %c0_i32_1 = arith.constant 0 : i32
    %c0_i32_2 = arith.constant 0 : i32
    return %c0_i32, %c0_i32_0, %c0_i32_1 : i32, i32, i32
  }
  func.func @transform_1(%arg0: i32) -> (i32, i32, i32) {
    %c0_i32 = arith.constant 0 : i32
    %c0_i32_0 = arith.constant 0 : i32
    %c0_i32_1 = arith.constant 0 : i32
    %c0_i32_2 = arith.constant 0 : i32
    return %c0_i32, %c0_i32_0, %c0_i32_1 : i32, i32, i32
  }
  func.func @transform_2(%arg0: i32) -> (i32, i32, i32) {
    %c0_i32 = arith.constant 0 : i32
    %c0_i32_0 = arith.constant 0 : i32
    %c0_i32_1 = arith.constant 0 : i32
    %c0_i32_2 = arith.constant 0 : i32
    return %c0_i32, %c0_i32_0, %c0_i32_1 : i32, i32, i32
  }
  func.func @transform_3(%arg0: i32) -> (i32, i32, i32) {
    %c0_i32 = arith.constant 0 : i32
    %c0_i32_0 = arith.constant 0 : i32
    %c0_i32_1 = arith.constant 0 : i32
    %c0_i32_2 = arith.constant 0 : i32
    return %c0_i32, %c0_i32_0, %c0_i32_1 : i32, i32, i32
  }
  func.func @transform_4(%arg0: i32) -> (i32, i32, i32) {
    %c0_i32 = arith.constant 0 : i32
    %c0_i32_0 = arith.constant 0 : i32
    %c0_i32_1 = arith.constant 0 : i32
    %c0_i32_2 = arith.constant 0 : i32
    return %c0_i32, %c0_i32_0, %c0_i32_1 : i32, i32, i32
  }
  func.func @transform_5(%arg0: i32) -> (i32, i32, i32) {
    %c0_i32 = arith.constant 0 : i32
    %c0_i32_0 = arith.constant 0 : i32
    %c0_i32_1 = arith.constant 0 : i32
    %c0_i32_2 = arith.constant 0 : i32
    return %c0_i32, %c0_i32_0, %c0_i32_1 : i32, i32, i32
  }
  func.func @transform_6(%arg0: i32) -> (i32, i32, i32) {
    %c0_i32 = arith.constant 0 : i32
    %c0_i32_0 = arith.constant 0 : i32
    %c0_i32_1 = arith.constant 0 : i32
    %c0_i32_2 = arith.constant 0 : i32
    return %c0_i32, %c0_i32_0, %c0_i32_1 : i32, i32, i32
  }
  func.func @transform_7(%arg0: i32) -> (i32, i32, i32) {
    %c0_i32 = arith.constant 0 : i32
    %c0_i32_0 = arith.constant 0 : i32
    %c0_i32_1 = arith.constant 0 : i32
    %c0_i32_2 = arith.constant 0 : i32
    return %c0_i32, %c0_i32_0, %c0_i32_1 : i32, i32, i32
  }
}

</mosaic_0001>

<bundles_post_ra>
// kernel: batch_norm_forward.1
= control target key start
LH: loop header
LB: loop body
LE: loop exit
PB: predicated region body
PF: predicated region fallthrough
CT: control target
= control target key end

     0   :  { %vm31_vm0 = vcmask 1043456   ;;  %v145_v10 = vmov 839922192   ;;  %v50_v12 = vlaneseq  ;;  %vm118_vm1 = vcmask 3072   ;;  %s231_s0 = inlined_call_operand.vmem [shape: f32[2,4,256], index: 0, kind: input, shape index: {}]   ;;  %s232_s3 = inlined_call_operand.vmem [shape: f32[1,4,1], index: 3, kind: input, shape index: {}]   ;;  %s233_s6 = inlined_call_operand.vmem [shape: f32[1,4,1], index: 6, kind: output, shape index: {1}]   ;;  %s234_s2 = inlined_call_operand.vmem [shape: f32[1,4,1], index: 2, kind: input, shape index: {}]   ;;  %s235_s4 = inlined_call_operand.vmem [shape: f32[1,4,1], index: 4, kind: input, shape index: {}]   ;;  %s236_s7 = inlined_call_operand.vmem [shape: f32[1,4,1], index: 7, kind: output, shape index: {2}]   ;;  %s237_s1 = inlined_call_operand.vmem [shape: f32[1,4,1], index: 1, kind: input, shape index: {}]   ;;  %s238_s5 = inlined_call_operand.vmem [shape: f32[2,4,256], index: 5, kind: output, shape index: {0}]  }
   0x1   :  { %v23_v0 = vld [vmem:[%s231_s0] sm:$0xff]  ;;  %v24_v1 = vld [vmem:[%s231_s0 + $0x8] sm:$0xff]  ;;  %v48_v11 = vunpack.c.l.s4 %v145_v10  ;;  %v146_v39 = vmov 0  }
   0x2   :  { %v27_v2 = vcombine.high %v23_v0, %v23_v0  ;;  %v32_v3 = vsel %vm31_vm0, %v23_v0, 0.0  ;;  %v28_v4 = vcombine.high %v24_v1, %v24_v1  ;;  %v37_v6 = vsel %vm31_vm0, %v24_v1, 0.0  ;;  %v114_v18 = vld [vmem:[%s232_s3] sm:$0xf]  ;;  %139 = vset.pattern.permute.xlu0 %v146_v39  ;;  %140 = vset.pattern.permute.xlu1 %v146_v39 }
   0x3   :  { %v49_v14 = vunpack.c.0.s8 %v48_v11  ;;  %v51_v15 = vshrl.u32 %v50_v12, 7  ;;  %v115_v22 = vmul.f32 0.9, %v114_v18  ;;  %v97_v40 = vld [vmem:[%s234_s2] sm:$0xf] }
   0x4   :  { %v33_v5 = vsel %vm31_vm0, %v27_v2, 0.0  ;;  %v38_v7 = vsel %vm31_vm0, %v28_v4, 0.0  ;;  %v120_v44 = vld [vmem:[%s235_s4] sm:$0xf] }
   0x5   :  { %v34_v8 = vadd.f32 %v33_v5, %v32_v3  ;;  %v39_v9 = vadd.f32 %v38_v7, %v37_v6  ;;  %v52_v20 = vsub.s32 %v49_v14, %v51_v15  ;;  %v121_v47 = vmul.f32 0.9, %v120_v44  ;;  %v79_v52 = vld [vmem:[%s237_s1] sm:$0xf] }
   0x7   :  { %35 = vadd.xlane.f32.xlu0 %v34_v8 }
   0xb   :  { %40 = vadd.xlane.f32.xlu0 %v39_v9 }
  0x90   :  { %v36_v13 = vpop.xlane.xlu0 %35 }
  0x91   :  { %v42_v17 = vsel %vm31_vm0, %v36_v13, 0.0 }
  0x94   :  { %v41_v16 = vpop.xlane.xlu0 %40 }
  0x95   :  { %v43_v19 = vsel %vm31_vm0, %v41_v16, 0.0 }
  0x96   :  { %v44_v21 = vadd.f32 %v43_v19, %v42_v17 }
  0x98   :  { %v45_v23 = vmul.f32 0.001953125, %v44_v21 }
  0x9a   :  { %v53_v24 = vrot.slane %v45_v23, %v52_v20  ;;  %v116_v25 = vmul.f32 0.1, %v45_v23 }
  0x9c   :  { %v56_v26 = vsub.f32 %v24_v1, %v53_v24  ;;  %v117_v27 = vadd.f32 %v116_v25, %v115_v22  ;;  %v55_v28 = vsub.f32 %v23_v0, %v53_v24 }
  0x9e   :  { %119 = vst.msk [vmem:[%s233_s6] sm:$0xf] %vm118_vm1, %v117_v27  ;;  %v57_v29 = vmul.f32 %v55_v28, %v55_v28  ;;  %v58_v30 = vmul.f32 %v56_v26, %v56_v26 }
  0xa0   :  { %v61_v31 = vcombine.high %v57_v29, %v57_v29  ;;  %v62_v32 = vcombine.high %v58_v30, %v58_v30  ;;  %v65_v33 = vsel %vm31_vm0, %v57_v29, 0.0  ;;  %v70_v37 = vsel %vm31_vm0, %v58_v30, 0.0 }
  0xa2   :  { %v66_v34 = vsel %vm31_vm0, %v61_v31, 0.0  ;;  %v71_v36 = vsel %vm31_vm0, %v62_v32, 0.0 }
  0xa3   :  { %v67_v35 = vadd.f32 %v66_v34, %v65_v33  ;;  %v72_v38 = vadd.f32 %v71_v36, %v70_v37 }
  0xa5   :  { %68 = vadd.xlane.f32.xlu1 %v67_v35 }
  0xa9   :  { %73 = vadd.xlane.f32.xlu1 %v72_v38 }
  0xba   :  { %100 = vperm.xlu1 %140, %v97_v40  }
 0x12e   :  { %v69_v41 = vpop.xlane.xlu1 %68 }
 0x12f   :  { %v75_v43 = vsel %vm31_vm0, %v69_v41, 0.0 }
 0x132   :  { %v74_v42 = vpop.xlane.xlu1 %73 }
 0x133   :  { %v76_v45 = vsel %vm31_vm0, %v74_v42, 0.0 }
 0x134   :  { %v77_v46 = vadd.f32 %v76_v45, %v75_v43 }
 0x136   :  { %v78_v48 = vmul.f32 0.001953125, %v77_v46  ;;  %v101_v55 = vpop.permute.xlu1 %100 }
 0x137   :  { %v108_v58 = vrot.slane %v101_v55, %v52_v20 }
 0x138   :  { %v80_v49 = vadd.f32 1e-05, %v78_v48  ;;  %v122_v50 = vmul.f32 0.1, %v78_v48 }
 0x13a   :  { %143 = vrsqrt.f32 %v80_v49  ;;  %v123_v51 = vadd.f32 %v122_v50, %v121_v47 }
 0x13c   :  { %124 = vst.msk [vmem:[%s236_s7] sm:$0xf] %vm118_vm1, %v123_v51 }
 0x147   :  { %v144_v53 = vpop.eup %143 }
 0x148   :  { %v82_v54 = vmul.f32 %v144_v53, %v79_v52 }
 0x14a   :  { %85 = vperm.xlu0 %139, %v82_v54  }
 0x1c5   :  { %v86_v56 = vpop.permute.xlu0 %85 }
 0x1c6   :  { %v93_v57 = vrot.slane %v86_v56, %v52_v20 }
 0x1c8   :  { %v95_v59 = vmul.f32 %v93_v57, %v55_v28  ;;  %v96_v60 = vmul.f32 %v93_v57, %v56_v26 }
 0x1ca   :  { %v110_v61 = vadd.f32 %v108_v58, %v95_v59  ;;  %v111_v62 = vadd.f32 %v108_v58, %v96_v60 }
 0x1cc   :  { %112 = vst [vmem:[%s238_s5] sm:$0xff] %v110_v61  ;;  %113 = vst [vmem:[%s238_s5 + $0x8] sm:$0xff] %v111_v62 }

</bundles_post_ra>
